<compile_context>
chip_gen: v7x
topology: tpu7x:2x2x1
jax: 0.10.0
libtpu: 0.0.40
codegen_flags: <defaults>
</compile_context>

<pallas_src>
from typing import NamedTuple

import jax
import jax.numpy as jnp
from jax.experimental import pallas as pl
from jax.experimental.pallas import tpu as pltpu

_LANE = 128   # vreg lane width (last-dim alignment)
_SUB = 16     # batch-tile granularity (bf16 sublane packing)


def _round_up(n, m):
    return ((n + m - 1) // m) * m


def _device_kind() -> str:
    try:
        return jax.devices()[0].device_kind.lower()
    except Exception:
        return ""


def _is_v7x(kind: str) -> bool:
    return "v7" in kind


def _vmem_limit_bytes(kind: str) -> int:
    # Generation-aware scoped-VMEM limit: well inside 64 MiB physical on v7x,
    # well inside 128 MiB on v5e/v6e, and far above the default scoped limits
    # (16 MiB v5e / 32 MiB v6e,v7x) so large batch tiles are allowed.
    return (40 if _is_v7x(kind) else 64) * 1024 * 1024


def _act_dtype(kind: str):
    # bf16 VPU/EUP exists on v6e/v7x; v5e (and older) get the fp32 tanh path.
    return jnp.bfloat16 if ("v6" in kind or "v7" in kind) else jnp.float32


def _const_block_spec(shape, index_map):
    """BlockSpec for a VMEM-resident operand (constant index_map).

    Single-buffered (pl.Buffered(1)) — double-buffering a constant operand
    just doubles its VMEM footprint.  Falls back to the default spec on jax
    versions without BlockSpec.pipeline_mode.
    """
    try:
        return pl.BlockSpec(shape, index_map, pipeline_mode=pl.Buffered(1))
    except (TypeError, AttributeError):
        return pl.BlockSpec(shape, index_map)


# --------------------------------------------------------------------------
# One-time weight preparation (hoisted out of the per-stage dynamics call).
# --------------------------------------------------------------------------
class PreparedODEParams(NamedTuple):
    w1p: jax.Array   # (Dp, Hp) bf16
    b1p: jax.Array   # (1, Hp) fp32
    w2p: jax.Array   # (Hp, Dp) bf16
    b2p: jax.Array   # (1, Dp) fp32
    dim: int         # original D
    hidden: int      # original H
    mode: str        # "resident" | "htiled"
    th: int          # hidden-dim tile (== Hp in resident mode)


def prepare_params(params, *, force_mode=None, force_th=None):
    """Pad weights to lane-dense shapes, cast to bf16, pick the tiling plan."""
    w1, b1, w2, b2 = params
    D, H = int(w1.shape[0]), int(w1.shape[1])
    kind = _device_kind()
    budget = int(_vmem_limit_bytes(kind) * 0.8)          # 20% headroom
    act_b = 2 if _act_dtype(kind) == jnp.bfloat16 else 4

    Dp = _round_up(D, _LANE)
    Hp0 = _round_up(H, _LANE)

    # Resident-weight footprint (weights single-buffered) plus one minimal
    # (16-row) batch tile of activations / I-O buffers.
    resident_w = 2 * Dp * Hp0 + 2 * Hp0 * Dp + 8 * Hp0 * 4 + 8 * Dp * 4
    per_row = 2 * Dp * 4 + 2 * Dp * 4 + Hp0 * (6 + act_b) + Dp * 4
    fits_resident = resident_w + _SUB * per_row <= budget

    mode = force_mode or ("resident" if fits_resident else "htiled")

    if mode == "resident":
        th = Hp0
    else:
        # Solve for the largest hidden-dim tile that keeps the (double
        # buffered) W1/W2/b1 blocks + a 256-row batch tile inside the budget.
        tb_assume = 256
        coef = 8 * Dp + 64 + tb_assume * (6 + act_b)     # bytes per TH column
        const = 32 * Dp + tb_assume * (20 * Dp)          # TH-independent bytes
        th_cap = max(_LANE, ((budget - const) // max(coef, 1)) // _LANE * _LANE)
        th = min(Hp0, th_cap)
        nh = pl.cdiv(Hp0, th)
        th = _round_up(pl.cdiv(Hp0, nh), _LANE)          # balanced H tiles

    if force_th is not None:
        th = min(Hp0, _round_up(int(force_th), _LANE))

    Hp = _round_up(Hp0, th)   # pad H so TH divides it exactly

    f32, bf16 = jnp.float32, jnp.bfloat16
    w1p = jnp.zeros((Dp, Hp), bf16).at[:D, :H].set(w1.astype(bf16))
    b1p = jnp.zeros((1, Hp), f32).at[:, :H].set(jnp.reshape(b1, (1, -1)).astype(f32))
    w2p = jnp.zeros((Hp, Dp), bf16).at[:H, :D].set(w2.astype(bf16))
    b2p = jnp.zeros((1, Dp), f32).at[:, :D].set(jnp.reshape(b2, (1, -1)).astype(f32))
    return PreparedODEParams(w1p, b1p, w2p, b2p, D, H, mode, int(th))


# --------------------------------------------------------------------------
# Kernels.
# --------------------------------------------------------------------------
def _resident_kernel(act_dtype):
    # Weights fully VMEM-resident; one batch tile per grid step.
    def kernel(x_ref, w1_ref, b1_ref, w2_ref, b2_ref, o_ref):
        x = x_ref[...].astype(jnp.bfloat16)
        h = jnp.dot(x, w1_ref[...], preferred_element_type=jnp.float32)
        h = jnp.tanh((h + b1_ref[...]).astype(act_dtype))
        y = jnp.dot(h.astype(jnp.bfloat16), w2_ref[...],
                    preferred_element_type=jnp.float32)
        o_ref[...] = (y + b2_ref[...]).astype(o_ref.dtype)      # lane-dense store
    return kernel


def _htiled_kernel(act_dtype):
    # Hidden dim tiled on the (trailing, "arbitrary") grid axis with an fp32
    # VMEM accumulator; x / output / acc stay resident across the H axis.
    def kernel(x_ref, w1_ref, b1_ref, w2_ref, b2_ref, o_ref, acc_ref):
        hk = pl.program_id(1)

        @pl.when(hk == 0)
        def _():
            acc_ref[...] = jnp.zeros_like(acc_ref)

        x = x_ref[...].astype(jnp.bfloat16)
        h = jnp.dot(x, w1_ref[...], preferred_element_type=jnp.float32)
        h = jnp.tanh((h + b1_ref[...]).astype(act_dtype))
        acc_ref[...] += jnp.dot(h.astype(jnp.bfloat16), w2_ref[...],
                                preferred_element_type=jnp.float32)

        @pl.when(hk == pl.num_programs(1) - 1)
        def _():
            o_ref[...] = (acc_ref[...] + b2_ref[...]).astype(o_ref.dtype)
    return kernel


# --------------------------------------------------------------------------
# Host-side planning + pallas_call wrapper.
# --------------------------------------------------------------------------
def _plan_batch(B, Dp, Hp, th, mode, kind):
    budget = int(_vmem_limit_bytes(kind) * 0.8)
    act_b = 2 if _act_dtype(kind) == jnp.bfloat16 else 4
    if mode == "resident":
        resident = 2 * Dp * Hp + 2 * Hp * Dp + 8 * Hp * 4 + 8 * Dp * 4
        per_row = 2 * Dp * 4 + 2 * Dp * 4 + Hp * (6 + act_b) + Dp * 4
    else:
        # double-buffered W1/W2/b1 H-blocks + single-buffered b2
        resident = 2 * (2 * Dp * th) + 2 * (2 * th * Dp) + 2 * 8 * th * 4 + 8 * Dp * 4
        per_row = 2 * Dp * 4 + 2 * Dp * 4 + th * (6 + act_b) + 2 * Dp * 4

    B16 = _round_up(max(int(B), 1), _SUB)
    cap = (budget - resident) // max(per_row, 1)
    cap = max(_SUB, min(1024, (cap // _SUB) * _SUB))
    tb = min(cap, B16)
    nb = pl.cdiv(B16, tb)
    if _is_v7x(kind) and nb == 1 and B16 >= 2 * _SUB:
        nb = 2                                   # give each v7x TC >=1 tile
    tb = _round_up(pl.cdiv(B16, nb), _SUB)       # balanced tiles
    return tb, nb, tb * nb


def ode_func(x, params):
    """The wrapped time-independent ODE dynamics, as a single Pallas kernel."""
    if not isinstance(params, PreparedODEParams):
        # Hoist this out of the integrator loop via prepare_params() to avoid
        # re-paying the weight padding/cast HBM pass per dynamics evaluation.
        params = prepare_params(params)
    w1p, b1p, w2p, b2p, D, H, mode, TH = params

    B = int(x.shape[0])
    Dp, Hp = int(w1p.shape[0]), int(w1p.shape[1])
    kind = _device_kind()
    act_dt = _act_dtype(kind)
    TB, nb, Bp = _plan_batch(B, Dp, Hp, TH, mode, kind)
    out_dtype = x.dtype

    # Pad x only if actually needed; otherwise feed it straight through (the
    # kernel casts to bf16 in-register), saving a full HBM pass over x.
    if (Bp, Dp) == (B, D):
        xp = x
    else:
        xp = jnp.zeros((Bp, Dp), jnp.bfloat16).at[:B, :D].set(
            x.astype(jnp.bfloat16))

    nh = Hp // TH
    flops = 4 * Bp * Dp * Hp                      # two matmuls
    transcendentals = Bp * Hp                     # tanh
    bytes_accessed = int(xp.size * xp.dtype.itemsize
                         + w1p.size * 2 + w2p.size * 2
                         + b1p.size * 4 + b2p.size * 4
                         + Bp * Dp * jnp.dtype(out_dtype).itemsize)
    cost = pl.CostEstimate(flops=flops, transcendentals=transcendentals,
                           bytes_accessed=bytes_accessed)
    vmem_limit = _vmem_limit_bytes(kind)

    if mode == "resident":
        out = pl.pallas_call(
            _resident_kernel(act_dt),
            out_shape=jax.ShapeDtypeStruct((Bp, Dp), out_dtype),
            grid=(nb,),
            in_specs=[
                pl.BlockSpec((TB, Dp), lambda i: (i, 0)),        # x: batch tiled
                _const_block_spec((Dp, Hp), lambda i: (0, 0)),   # W1 resident
                _const_block_spec((1, Hp), lambda i: (0, 0)),    # b1 resident
                _const_block_spec((Hp, Dp), lambda i: (0, 0)),   # W2 resident
                _const_block_spec((1, Dp), lambda i: (0, 0)),    # b2 resident
            ],
            out_specs=pl.BlockSpec((TB, Dp), lambda i: (i, 0)),
            compiler_params=pltpu.CompilerParams(
                dimension_semantics=("parallel",),
                vmem_limit_bytes=vmem_limit),
            cost_estimate=cost,
        )(xp, w1p, b1p, w2p, b2p)
    else:
        out = pl.pallas_call(
            _htiled_kernel(act_dt),
            out_shape=jax.ShapeDtypeStruct((Bp, Dp), out_dtype),
            grid=(nb, nh),
            in_specs=[
                pl.BlockSpec((TB, Dp), lambda i, k: (i, 0)),     # x (resident over k)
                pl.BlockSpec((Dp, TH), lambda i, k: (0, k)),     # W1 H-block
                pl.BlockSpec((1, TH), lambda i, k: (0, k)),      # b1 H-block
                pl.BlockSpec((TH, Dp), lambda i, k: (k, 0)),     # W2 H-block
                _const_block_spec((1, Dp), lambda i, k: (0, 0)), # b2 resident
            ],
            out_specs=pl.BlockSpec((TB, Dp), lambda i, k: (i, 0)),
            scratch_shapes=[pltpu.VMEM((TB, Dp), jnp.float32)],  # fp32 acc
            compiler_params=pltpu.CompilerParams(
                dimension_semantics=("parallel", "arbitrary"),
                vmem_limit_bytes=vmem_limit),
            cost_estimate=cost,
        )(xp, w1p, b1p, w2p, b2p)

    if (Bp, Dp) == (B, D):
        return out
    return out[:B, :D]


def wrap_time_indep_ode_forward(t, x, params):
    """forward(t, x) -> ode(x)   (t is ignored, exactly like the nn.Module)."""
    del t  # time-independent: the wrapper drops t
    return ode_func(x, params)


def init_params(key, dim, hidden, dtype=jnp.float32):
    k1, k2, k3, k4 = jax.random.split(key, 4)
    w1 = jax.random.normal(k1, (dim, hidden), dtype) * 0.1
    b1 = jax.random.normal(k2, (1, hidden), dtype) * 0.1
    w2 = jax.random.normal(k3, (hidden, dim), dtype) * 0.1
    b2 = jax.random.normal(k4, (1, dim), dtype) * 0.1
    return (w1, b1, w2, b2)


if __name__ == "__main__":
    key = jax.random.PRNGKey(0)
    kx, kp, kx2, kp2 = jax.random.split(key, 4)
    t = jnp.float32(0.5)  # arbitrary; must be ignored by the wrapper

    # --- Test 1: default (resident-weight) path ---------------------------
    B, D, H = 8, 32, 64
    x = jax.random.normal(kx, (B, D), jnp.float32)
    params = init_params(kp, D, H)
    prepped = prepare_params(params)          # one-time weight prep (hoisted)

    y = jax.block_until_ready(wrap_time_indep_ode_forward(t, x, prepped))
    w1, b1, w2, b2 = params
    y_ref = jnp.tanh(x @ w1 + b1) @ w2 + b2   # fp32 reference (same semantics)
    assert y.shape == (B, D)
    assert jnp.allclose(y, y_ref, atol=3e-2, rtol=3e-2), (
        float(jnp.max(jnp.abs(y - y_ref))))

    # --- Test 2: H-tiled fallback path (forced, 3 reduction steps) --------
    B2, D2, H2 = 24, 48, 320
    x2 = jax.random.normal(kx2, (B2, D2), jnp.float32)
    params2 = init_params(kp2, D2, H2)
    prepped2 = prepare_params(params2, force_mode="htiled", force_th=128)
    y2 = jax.block_until_ready(wrap_time_indep_ode_forward(t, x2, prepped2))
    w1b, b1b, w2b, b2b = params2
    y2_ref = jnp.tanh(x2 @ w1b + b1b) @ w2b + b2b
    assert y2.shape == (B2, D2)
    assert jnp.allclose(y2, y2_ref, atol=6e-2, rtol=6e-2), (
        float(jnp.max(jnp.abs(y2 - y2_ref))))

    print("KERNEL_OK")
</pallas_src>

<mosaic_0001>
module attributes {stable_mosaic.version = 11 : i64} {
  func.func @kernel(%arg0: i32, %arg1: memref<16x128xbf16, #tpu.memory_space<vmem>>, %arg2: memref<128x128xbf16, #tpu.memory_space<vmem>>, %arg3: memref<1x128xf32, #tpu.memory_space<vmem>>, %arg4: memref<128x128xbf16, #tpu.memory_space<vmem>>, %arg5: memref<1x128xf32, #tpu.memory_space<vmem>>, %arg6: memref<16x128xf32, #tpu.memory_space<vmem>>) attributes {dimension_semantics = [#tpu.dimension_semantics<parallel>], iteration_bounds = array<i64: 1>, scalar_prefetch = 0 : i64, scratch_operands = 0 : i64, tpu.core_type = #tpu.core_type<tc>, window_params = [{transform_indices = @transform_0, window_bounds = array<i64: 16, 128>}, {pipeline_mode = #tpu.pipeline_mode<synchronous>, transform_indices = @transform_1, window_bounds = array<i64: 128, 128>}, {pipeline_mode = #tpu.pipeline_mode<synchronous>, transform_indices = @transform_2, window_bounds = array<i64: 1, 128>}, {pipeline_mode = #tpu.pipeline_mode<synchronous>, transform_indices = @transform_3, window_bounds = array<i64: 128, 128>}, {pipeline_mode = #tpu.pipeline_mode<synchronous>, transform_indices = @transform_4, window_bounds = array<i64: 1, 128>}, {transform_indices = @transform_5, window_bounds = array<i64: 16, 128>}]} {
    %c0 = arith.constant 0 : index
    %c0_0 = arith.constant 0 : index
    %0 = vector.load %arg1[%c0, %c0_0] : memref<16x128xbf16, #tpu.memory_space<vmem>>, vector<16x128xbf16>
    %c0_1 = arith.constant 0 : index
    %c0_2 = arith.constant 0 : index
    %1 = vector.load %arg2[%c0_1, %c0_2] : memref<128x128xbf16, #tpu.memory_space<vmem>>, vector<128x128xbf16>
    %cst = arith.constant dense<0.000000e+00> : vector<16x128xf32>
    %2 = tpu.matmul %0, %1, %cst {dimension_numbers = #tpu.dot_dimension_numbers<[1], [0], [0], [1], [0, 0, 1, 1], [], []>} : vector<16x128xbf16>, vector<128x128xbf16>, vector<16x128xf32> -> vector<16x128xf32>
    %c0_3 = arith.constant 0 : index
    %c0_4 = arith.constant 0 : index
    %3 = vector.load %arg3[%c0_3, %c0_4] : memref<1x128xf32, #tpu.memory_space<vmem>>, vector<1x128xf32>
    %4 = vector.broadcast %3 : vector<1x128xf32> to vector<16x128xf32>
    %5 = arith.addf %2, %4 : vector<16x128xf32>
    %6 = math.tanh %5 : vector<16x128xf32>
    %7 = arith.truncf %6 : vector<16x128xf32> to vector<16x128xbf16>
    %c0_5 = arith.constant 0 : index
    %c0_6 = arith.constant 0 : index
    %8 = vector.load %arg4[%c0_5, %c0_6] : memref<128x128xbf16, #tpu.memory_space<vmem>>, vector<128x128xbf16>
    %cst_7 = arith.constant dense<0.000000e+00> : vector<16x128xf32>
    %9 = tpu.matmul %7, %8, %cst_7 {dimension_numbers = #tpu.dot_dimension_numbers<[1], [0], [0], [1], [0, 0, 1, 1], [], []>} : vector<16x128xbf16>, vector<128x128xbf16>, vector<16x128xf32> -> vector<16x128xf32>
    %c0_8 = arith.constant 0 : index
    %c0_9 = arith.constant 0 : index
    %10 = vector.load %arg5[%c0_8, %c0_9] : memref<1x128xf32, #tpu.memory_space<vmem>>, vector<1x128xf32>
    %11 = vector.broadcast %10 : vector<1x128xf32> to vector<16x128xf32>
    %12 = arith.addf %9, %11 : vector<16x128xf32>
    %c0_10 = arith.constant 0 : index
    %c0_11 = arith.constant 0 : index
    %13 = vector.load %arg6[%c0_10, %c0_11] : memref<16x128xf32, #tpu.memory_space<vmem>>, vector<16x128xf32>
    tpu.vector_store %arg6[%c0_10, %c0_11], %12 {strides = array<i32>} : memref<16x128xf32, #tpu.memory_space<vmem>>, vector<16x128xf32>,
    return
  }
  func.func @transform_0(%arg0: i32) -> (i32, i32) {
    %c0_i32 = arith.constant 0 : i32
    %c0_i32_0 = arith.constant 0 : i32
    return %arg0, %c0_i32 : i32, i32
  }
  func.func @transform_1(%arg0: i32) -> (i32, i32) {
    %c0_i32 = arith.constant 0 : i32
    %c0_i32_0 = arith.constant 0 : i32
    %c0_i32_1 = arith.constant 0 : i32
    return %c0_i32, %c0_i32_0 : i32, i32
  }
  func.func @transform_2(%arg0: i32) -> (i32, i32) {
    %c0_i32 = arith.constant 0 : i32
    %c0_i32_0 = arith.constant 0 : i32
    %c0_i32_1 = arith.constant 0 : i32
    return %c0_i32, %c0_i32_0 : i32, i32
  }
  func.func @transform_3(%arg0: i32) -> (i32, i32) {
    %c0_i32 = arith.constant 0 : i32
    %c0_i32_0 = arith.constant 0 : i32
    %c0_i32_1 = arith.constant 0 : i32
    return %c0_i32, %c0_i32_0 : i32, i32
  }
  func.func @transform_4(%arg0: i32) -> (i32, i32) {
    %c0_i32 = arith.constant 0 : i32
    %c0_i32_0 = arith.constant 0 : i32
    %c0_i32_1 = arith.constant 0 : i32
    return %c0_i32, %c0_i32_0 : i32, i32
  }
  func.func @transform_5(%arg0: i32) -> (i32, i32) {
    %c0_i32 = arith.constant 0 : i32
    %c0_i32_0 = arith.constant 0 : i32
    return %arg0, %c0_i32 : i32, i32
  }
}

</mosaic_0001>

<bundles_post_ra>
// kernel: tpu_custom_call.1
= control target key start
LH: loop header
LB: loop body
LE: loop exit
PB: predicated region body
PF: predicated region fallthrough
CT: control target
= control target key end

     0   :  { %10 = vsyncpa [#allocation3], 0  ;;  %s722_s0 = inlined_call_operand.hbm [shape: bf16[16,128], index: 0, kind: input, shape index: {}]   ;;  %s723_s1 = inlined_call_operand.hbm [shape: bf16[128,128], index: 1, kind: input, shape index: {}]   ;;  %s724_s2 = inlined_call_operand.hbm [shape: f32[1,128], index: 2, kind: input, shape index: {}]   ;;  %s725_s3 = inlined_call_operand.hbm [shape: bf16[128,128], index: 3, kind: input, shape index: {}]   ;;  %s726_s4 = inlined_call_operand.hbm [shape: f32[1,128], index: 4, kind: input, shape index: {}]   ;;  %s727_s5 = inlined_call_operand.hbm [shape: f32[16,128], index: 5, kind: output, shape index: {}]  }
   0x1   :  { %11 = vsyncpa [#allocation6], 0 }
   0x2   :  { %12 = vsyncpa [#allocation9], 0 }
   0x3   :  { %13 = vsyncpa [#allocation4], 0  ;;  %s592_s18 = smov [#allocation5]   ;;  %s593_s20 = smov [#allocation8]  }
   0x4   :  { %s31_s19 = sshll.u32 %s592_s18, 4  ;;  %s53_s21 = sshll.u32 %s593_s20, 4  ;;  %s32_s19 = int_to_ptr.vmem [resolvable:$true] %s31_s19  ;;  %s634_s21 = int_to_ptr.vmem [resolvable:$true] %s53_s21 }
   0x5   :  { %s452_s24 = scalar_lea.hbm %s723_s1, 1024 }
   0x6   :  { %p453_p0 = scmp.ne.s32.totalorder %s723_s1, %s452_s24  ;;  %p456_p1 = scmp.lt.u32.totalorder %s452_s24, %s723_s1 }
   0x8   :  { %p458_p2 = pnand %p456_p1, %p453_p0 }
   0xa   :  { %461 = shalt.err (!%p458_p2)
}
   0xb   :  { %s462_s29 = scalar_lea.vmem %s32_s19, 1024  ;;  %p467_p4 = scmp.lt.s32.totalorder %s32_s19, %s32_s19 }
   0xc   :  { %p463_p3 = scmp.ne.s32.totalorder %s32_s19, %s462_s29  ;;  %p468_p5 = scmp.lt.s32.totalorder %s462_s29, %s462_s29 }
   0xe   :  { %p469_p6 = por %p468_p5, %p467_p4 }
  0x10   :  { %p470_p7 = pnand %p469_p6, %p463_p3 }
  0x12   :  { %473 = shalt.err (!%p470_p7)
}
  0x13   :  { %s594_s30 = smov 64   ;;  %s595_s6 = smov 4  }
  0x14   :  { %37 = dma.hbm_to_vmem [thread:$0]  %s723_s1, 1024, %s32_s19, [#allocation6], %s594_s30, %s594_s30, %s595_s6  }
  0x15   :  { %s474_s11 = scalar_lea.hbm %s725_s3, 1024 }
  0x16   :  { %p475_p8 = scmp.ne.s32.totalorder %s725_s3, %s474_s11  ;;  %p478_p9 = scmp.lt.u32.totalorder %s474_s11, %s725_s3 }
  0x18   :  { %p480_p10 = pnand %p478_p9, %p475_p8 }
  0x1a   :  { %483 = shalt.err (!%p480_p10)
}
  0x1b   :  { %s484_s16 = scalar_lea.vmem %s634_s21, 1024  ;;  %p489_p12 = scmp.lt.s32.totalorder %s634_s21, %s634_s21 }
  0x1c   :  { %p485_p11 = scmp.ne.s32.totalorder %s634_s21, %s484_s16  ;;  %p490_p13 = scmp.lt.s32.totalorder %s484_s16, %s484_s16 }
  0x1e   :  { %p491_p0 = por %p490_p13, %p489_p12 }
  0x20   :  { %p492_p1 = pnand %p491_p0, %p485_p11 }
  0x22   :  { %495 = shalt.err (!%p492_p1)
}
  0x23   :  { %59 = dma.hbm_to_vmem [thread:$0]  %s725_s3, 1024, %s634_s21, [#allocation9], %s594_s30, %s594_s30, %s595_s6  }
  0x24   :  { %s596_s18 = smov [#allocation2]   ;;  %s597_s20 = smov [#allocation7]  }
  0x25   :  { %s19_s19 = sshll.u32 %s596_s18, 4  ;;  %s44_s22 = sshll.u32 %s597_s20, 4  ;;  %s20_s19 = int_to_ptr.vmem [resolvable:$true] %s19_s19  ;;  %s45_s22 = int_to_ptr.vmem [resolvable:$true] %s44_s22 }
  0x26   :  { %s496_s25 = scalar_lea.hbm %s722_s0, 128 }
  0x27   :  { %p497_p2 = scmp.ne.s32.totalorder %s722_s0, %s496_s25  ;;  %p500_p3 = scmp.lt.u32.totalorder %s496_s25, %s722_s0 }
  0x29   :  { %p502_p4 = pnand %p500_p3, %p497_p2 }
  0x2b   :  { %505 = shalt.err (!%p502_p4)
}
  0x2c   :  { %s506_s3 = scalar_lea.vmem %s20_s19, 128  ;;  %p511_p6 = scmp.lt.s32.totalorder %s20_s19, %s20_s19 }
  0x2d   :  { %p507_p5 = scmp.ne.s32.totalorder %s20_s19, %s506_s3  ;;  %p512_p7 = scmp.lt.s32.totalorder %s506_s3, %s506_s3 }
  0x2f   :  { %p513_p8 = por %p512_p7, %p511_p6 }
  0x31   :  { %p514_p9 = pnand %p513_p8, %p507_p5 }
  0x33   :  { %517 = shalt.err (!%p514_p9)
}
  0x34   :  { %25 = dma.hbm_to_vmem [thread:$0]  %s722_s0, 128, %s20_s19, [#allocation3], %s594_s30, %s594_s30, %s595_s6  }
  0x35   :  { %s518_s10 = scalar_lea.hbm %s724_s2, 16 }
  0x36   :  { %p519_p10 = scmp.ne.s32.totalorder %s724_s2, %s518_s10  ;;  %p522_p11 = scmp.lt.u32.totalorder %s518_s10, %s724_s2 }
  0x38   :  { %p524_p12 = pnand %p522_p11, %p519_p10 }
  0x3a   :  { %527 = shalt.err (!%p524_p12)
}
  0x3b   :  { %s528_s15 = scalar_lea.vmem %s45_s22, 16  ;;  %s532_s16 = scalar_lea.vmem %s45_s22, 32 }
  0x3c   :  { %p529_p13 = scmp.ne.s32.totalorder %s45_s22, %s528_s15  ;;  %p533_p0 = scmp.lt.s32.totalorder %s45_s22, %s45_s22 }
  0x3d   :  { %p534_p1 = scmp.lt.s32.totalorder %s532_s16, %s528_s15 }
  0x3f   :  { %p535_p2 = por %p534_p1, %p533_p0 }
  0x41   :  { %p536_p3 = pnand %p535_p2, %p529_p13 }
  0x43   :  { %539 = shalt.err (!%p536_p3)
}
  0x44   :  { %47 = dma.hbm_to_vmem [thread:$0]  %s724_s2, 16, %s45_s22, [#allocation6]  }
  0x45   :  { %s598_s6 = smov [#allocation10]   ;;  %s540_s19 = scalar_lea.hbm %s726_s4, 16 }
  0x46   :  { %s66_s1 = sshll.u32 %s598_s6, 4  ;;  %p541_p4 = scmp.ne.s32.totalorder %s726_s4, %s540_s19  ;;  %s67_s1 = int_to_ptr.vmem [resolvable:$true] %s66_s1 }
  0x47   :  { %p544_p5 = scmp.lt.u32.totalorder %s540_s19, %s726_s4 }
  0x49   :  { %p546_p6 = pnand %p544_p5, %p541_p4 }
  0x4b   :  { %549 = shalt.err (!%p546_p6)
}
  0x4c   :  { %s550_s26 = scalar_lea.vmem %s67_s1, 16  ;;  %s554_s2 = scalar_lea.vmem %s67_s1, 32 }
  0x4d   :  { %p551_p7 = scmp.ne.s32.totalorder %s67_s1, %s550_s26  ;;  %p555_p8 = scmp.lt.s32.totalorder %s67_s1, %s67_s1 }
  0x4e   :  { %p556_p9 = scmp.lt.s32.totalorder %s554_s2, %s550_s26 }
  0x50   :  { %p557_p10 = por %p556_p9, %p555_p8 }
  0x52   :  { %p558_p11 = pnand %p557_p10, %p551_p7 }
  0x54   :  { %561 = shalt.err (!%p558_p11)
}
  0x55   :  { %69 = dma.hbm_to_vmem [thread:$0]  %s726_s4, 16, %s67_s1, [#allocation9]  }
  0x56   :  { %584 = dma.done.wait [#allocation3], 128  }
  0x57   :  { %585 = vsyncadd [#allocation3], 4294967168 }
  0x58   :  { %586 = dma.done.wait [#allocation6], 1040  }
  0x59   :  { %587 = vsyncadd [#allocation6], 4294966256 }
  0x5a   :  { %588 = dma.done.wait [#allocation9], 1040  }
  0x5b   :  { %589 = vsyncadd [#allocation9], 4294966256  ;;  %v599_v0 = vmov 0.0   ;;  %vm600_vm0 = vmmov 0   ;;  %v431_v1 = vld [vmem:[#allocation5] sm:$0xff]   ;;  %v432_v2 = vld [vmem:[#allocation5 + $0x8] sm:$0xff]  }
  0x5c   :  { %379 = vmatprep.subr.bf16.mxu0 %v599_v0  ;;  %395 = vmatprep.mubr.msk.bf16.mxu0 %vm600_vm0, %v599_v0  ;;  %v433_v3 = vld [vmem:[#allocation5 + $0x10] sm:$0xff]   ;;  %v440_v4 = vld [vmem:[#allocation8] sm:$0xff]   ;;  %v434_v5 = vld [vmem:[#allocation5 + $0x18] sm:$0xff]   ;;  %s601_s4 = smov [#allocation11]  }
  0x5d   :  { %399 = vmatprep.subr.bf16.mxu1 %v599_v0  ;;  %415 = vmatprep.mubr.msk.bf16.mxu1 %vm600_vm0, %v599_v0  ;;  %v441_v6 = vld [vmem:[#allocation8 + $0x8] sm:$0xff]   ;;  %v435_v7 = vld [vmem:[#allocation5 + $0x20] sm:$0xff]   ;;  %v442_v8 = vld [vmem:[#allocation8 + $0x10] sm:$0xff]   ;;  %s328_s28 = sshll.u32 %s601_s4, 4  ;;  %s329_s28 = int_to_ptr.vmem [resolvable:$true] %s328_s28 }
  0x5e   :  { %380 = vmatpush3.bf16.msra.mxu0 %v431_v1  ;;  %400 = vmatpush3.bf16.msra.mxu1 %v440_v4  ;;  %v436_v9 = vld [vmem:[#allocation5 + $0x28] sm:$0xff]   ;;  %v443_v10 = vld [vmem:[#allocation8 + $0x18] sm:$0xff]   ;;  %v437_v11 = vld [vmem:[#allocation5 + $0x30] sm:$0xff]   ;;  %s562_s29 = scalar_lea.vmem %s329_s28, 256  ;;  %p567_p13 = scmp.lt.s32.totalorder %s329_s28, %s329_s28 }
  0x5f   :  { %381 = vmatprep.subr.bf16.mxu0 %v599_v0  ;;  %401 = vmatprep.subr.bf16.mxu1 %v599_v0  ;;  %v438_v12 = vld [vmem:[#allocation5 + $0x38] sm:$0xff]   ;;  %v444_v14 = vld [vmem:[#allocation8 + $0x20] sm:$0xff]   ;;  %v445_v15 = vld [vmem:[#allocation8 + $0x28] sm:$0xff]   ;;  %p563_p12 = scmp.ne.s32.totalorder %s329_s28, %s562_s29  ;;  %p568_p0 = scmp.lt.s32.totalorder %s562_s29, %s562_s29 }
  0x60   :  { %v439_v13 = vld [vmem:[#allocation2] sm:$0xff]   ;;  %v342_v18 = vld [vmem:[#allocation7] ss:$0 sm:$0xff]  ;;  %v352_v28 = vld [vmem:[#allocation10] ss:$0 sm:$0xff] }
  0x61   :  { %v446_v16 = vld [vmem:[#allocation8 + $0x30] sm:$0xff]   ;;  %v447_v17 = vld [vmem:[#allocation8 + $0x38] sm:$0xff]   ;;  %p569_p1 = por %p568_p0, %p567_p13 }
  0x62   :  { %382 = vmatpush3.bf16.msra.mxu0 %v432_v2  ;;  %402 = vmatpush3.bf16.msra.mxu1 %v441_v6 }
  0x63   :  { %383 = vmatprep.subr.bf16.mxu0 %v599_v0  ;;  %403 = vmatprep.subr.bf16.mxu1 %v599_v0  ;;  %p570_p2 = pnand %p569_p1, %p563_p12 }
  0x66   :  { %384 = vmatpush3.bf16.msra.mxu0 %v433_v3  ;;  %404 = vmatpush3.bf16.msra.mxu1 %v442_v8 }
  0x67   :  { %385 = vmatprep.subr.bf16.mxu0 %v599_v0  ;;  %405 = vmatprep.subr.bf16.mxu1 %v599_v0 }
  0x6a   :  { %386 = vmatpush3.bf16.msra.mxu0 %v434_v5  ;;  %406 = vmatpush3.bf16.msra.mxu1 %v443_v10 }
  0x6b   :  { %387 = vmatprep.subr.bf16.mxu0 %v599_v0  ;;  %407 = vmatprep.subr.bf16.mxu1 %v599_v0 }
  0x6e   :  { %388 = vmatpush3.bf16.msra.mxu0 %v435_v7  ;;  %408 = vmatpush3.bf16.msra.mxu1 %v444_v14 }
  0x6f   :  { %389 = vmatprep.subr.bf16.mxu0 %v599_v0  ;;  %409 = vmatprep.subr.bf16.mxu1 %v599_v0 }
  0x72   :  { %390 = vmatpush3.bf16.msra.mxu0 %v436_v9  ;;  %410 = vmatpush3.bf16.msra.mxu1 %v445_v15 }
  0x73   :  { %391 = vmatprep.subr.bf16.mxu0 %v599_v0  ;;  %411 = vmatprep.subr.bf16.mxu1 %v599_v0 }
  0x76   :  { %392 = vmatpush3.bf16.msra.mxu0 %v437_v11  ;;  %412 = vmatpush3.bf16.msra.mxu1 %v446_v16 }
  0x77   :  { %393 = vmatprep.subr.bf16.mxu0 %v599_v0  ;;  %413 = vmatprep.subr.bf16.mxu1 %v599_v0 }
  0x7a   :  { %394 = vmatpush3.bf16.msra.mxu0 %v438_v12  ;;  %414 = vmatpush3.bf16.msra.mxu1 %v447_v17 }
  0x7d   :  { %396 = vmatmul.mubr.bf16.vlgmr.msra.gmra.mrb[0].mxu0 %v439_v13 }
 0x150   :  { %v199_v19 = vpop.f32.mrb[0].mxu0 }
 0x151   :  { %v200_v20 = vadd.f32 %v342_v18, %v199_v19  ;;  %v397_v21 = vpop.f32.mrb[1].mxu0 }
 0x152   :  { %v202_v22 = vpop.f32.mrb[2].mxu0 }
 0x153   :  { %v203_v23 = vadd.f32 %v342_v18, %v202_v22  ;;  %v398_v24 = vpop.f32.mrb[3].mxu0  ;;  %448 = vtanh.f32 %v200_v20 }
 0x155   :  { %450 = vtanh.f32 %v203_v23 }
 0x15d   :  { %v449_v25 = vpop.eup %448 }
 0x15f   :  { %v451_v26 = vpop.eup %450 }
 0x160   :  { %v208_v27 = vpack.c.bf16 %v451_v26, %v449_v25 }
 0x162   :  { %416 = vmatmul.mubr.bf16.vlgmr.msra.gmra.mrb[0].mxu1 %v208_v27 }
 0x235   :  { %v314_v29 = vpop.f32.mrb[0].mxu1 }
 0x236   :  { %v315_v30 = vadd.f32 %v352_v28, %v314_v29  ;;  %v417_v31 = vpop.f32.mrb[1].mxu1 }
 0x237   :  { %v317_v32 = vpop.f32.mrb[2].mxu1 }
 0x238   :  { %321 = vst [vmem:[#allocation11] sm:$0xff] %v315_v30  ;;  %v318_v33 = vadd.f32 %v352_v28, %v317_v32  ;;  %v418_v34 = vpop.f32.mrb[3].mxu1 }
 0x23a   :  { %322 = vst [vmem:[#allocation11 + $0x8] sm:$0xff] %v318_v33 }
 0x23b   :  { %573 = shalt.err (!%p570_p2)
}
 0x23c   :  { %s574_s7 = scalar_lea.hbm %s727_s5, 256 }
 0x23d   :  { %p575_p3 = scmp.ne.s32.totalorder %s727_s5, %s574_s7  ;;  %p578_p4 = scmp.lt.u32.totalorder %s574_s7, %s727_s5 }
 0x23f   :  { %p580_p5 = pnand %p578_p4, %p575_p3 }
 0x241   :  { %583 = shalt.err (!%p580_p5)
}
 0x242   :  { %s602_s12 = smov 128   ;;  %s603_s13 = smov 8  }
 0x243   :  { %334 = dma.vmem_to_hbm [thread:$0]  %s329_s28, 256, %s727_s5, [#allocation4], %s602_s12, %s602_s12, %s603_s13  }
 0x244   :  { %590 = dma.done.wait [#allocation4], 256  }
 0x245   :  { %591 = vsyncadd [#allocation4], 4294967040 }
 0x246   :  { %338 = vsyncpa [#allocation3], 1 }
 0x247   :  { %339 = vsyncpa [#allocation6], 1 }
 0x248   :  { %340 = vsyncpa [#allocation9], 1 }
 0x249   :  { %341 = vsyncpa [#allocation4], 1 }

</bundles_post_ra>
